<compile_context>
chip_gen: v5e
topology: v5e:2x2
jax: 0.10.0
libtpu: 0.0.40
codegen_flags: <defaults>
</compile_context>

<pallas_src>
import math

import jax
import jax.numpy as jnp
from jax import lax
from jax.experimental import pallas as pl
from jax.experimental.pallas import tpu as pltpu


# ---------------------------------------------------------------------------
# Kernels
# ---------------------------------------------------------------------------
def _similarity_norm_kernel(inv_a_ref, inv_b_ref, a_ref, b_ref, o_ref):
    """One (TM, TN) output tile; inverse norms precomputed, post-applied on f32 acc.

    a_ref: (1, TM, D), b_ref: (1, TN, D) in native dtype (bf16 stays bf16 into the MXU);
    inv_a_ref: (1, TM, 1) f32, inv_b_ref: (1, 1, TN) f32; o_ref: (1, TM, TN).
    """
    sim = lax.dot_general(
        a_ref[0], b_ref[0],
        dimension_numbers=(((1,), (1,)), ((), ())),   # 'nt' contraction, no transpose
        preferred_element_type=jnp.float32,
    )                                                  # (TM, TN) f32 accumulator
    sim = sim * inv_a_ref[0]                           # (TM, 1) row-wise scale
    sim = sim * inv_b_ref[0]                           # (1, TN) col-wise scale
    o_ref[0] = sim.astype(o_ref.dtype)


def _similarity_plain_kernel(a_ref, b_ref, o_ref):
    sim = lax.dot_general(
        a_ref[0], b_ref[0],
        dimension_numbers=(((1,), (1,)), ((), ())),
        preferred_element_type=jnp.float32,
    )
    o_ref[0] = sim.astype(o_ref.dtype)


# ---------------------------------------------------------------------------
# Tile / VMEM planning
# ---------------------------------------------------------------------------
def _round_up(x, m):
    return ((x + m - 1) // m) * m


def _vmem_budget():
    """(per-step tile budget bytes, vmem_limit_bytes) — generation aware."""
    try:
        cap = int(pltpu.get_tpu_info().vmem_capacity_bytes)
    except Exception:
        cap = 64 * 1024 * 1024          # conservative: assume v7x-sized VMEM
    if cap >= 128 * 1024 * 1024:        # v5e / v6e (128 MiB physical VMEM)
        return 80 * 1024 * 1024, 96 * 1024 * 1024
    return 40 * 1024 * 1024, 48 * 1024 * 1024   # v7x (64 MiB physical VMEM)


def _footprint(tm, tn, d, in_isz, out_isz):
    """Double-buffered VMEM bytes for one grid step (a, b, out + padded inv tiles)."""
    return (2 * tm * d * in_isz                       # a tile (resident, still 2-buffered)
            + 2 * tn * d * in_isz                     # b tile (streamed)
            + 2 * tm * tn * out_isz                   # out tile
            + 2 * _round_up(tm, 8) * 128 * 4          # inv_a (tm,1) is lane-padded to 128
            + 2 * 8 * _round_up(tn, 128) * 4)         # inv_b (1,tn) is sublane-padded to 8


def _auto_tiles(S, D, in_isz, out_isz, budget):
    """Returns (TM, TN, S_pad). Bias toward large TM (fewer b re-reads), 256-aligned."""
    # Small / moderate S: one full-S block per batch (block == full dims is always legal).
    if S <= 1024 and _footprint(S, S, D, in_isz, out_isz) <= budget:
        return S, S, S
    s_pad = _round_up(S, 128)
    tm_cands = [t for t in (1024, 512, 256, 128) if s_pad % t == 0]
    tn_cands = [t for t in (512, 256, 128) if s_pad % t == 0]
    for tm in tm_cands:                      # largest TM first: cuts redundant b HBM reads
        for tn in tn_cands:
            if tn <= tm and _footprint(tm, tn, D, in_isz, out_isz) <= budget:
                return tm, tn, s_pad
    return 128, 128, s_pad


# ---------------------------------------------------------------------------
# Public wrapper
# ---------------------------------------------------------------------------
def similarity(a, b, *, eps=1e-8, normalize=True, out_dtype=None, tiles=None):
    """Cosine similarity: (B, S, D) x (B, S, D) -> (B, S, S).

    tiles: None (auto), int (TM = TN = tiles), or (TM, TN) tuple.
    out_dtype: output dtype (default: input dtype); bf16 halves the output writeback.
    """
    assert a.shape == b.shape and a.ndim == 3, "expect (B, S, D) inputs"
    B, S, D = a.shape
    out_dtype = jnp.dtype(out_dtype) if out_dtype is not None else jnp.dtype(a.dtype)
    in_isz = jnp.dtype(a.dtype).itemsize
    out_isz = out_dtype.itemsize

    budget, vmem_limit = _vmem_budget()
    if tiles is None:
        TM, TN, S_pad = _auto_tiles(S, D, in_isz, out_isz, budget)
    else:
        TM, TN = (tiles, tiles) if isinstance(tiles, int) else tuple(tiles)
        if S % TM == 0 and S % TN == 0:
            S_pad = S
        else:
            S_pad = _round_up(S, math.lcm(TM, TN))

    # Pad ragged seq_len (zero rows contribute 0 after the dot; sliced off below).
    if S_pad != S:
        pad = ((0, 0), (0, S_pad - S), (0, 0))
        a_p = jnp.pad(a, pad)
        b_p = jnp.pad(b, pad)
    else:
        a_p, b_p = a, b

    grid = (B, S_pad // TM, S_pad // TN)

    # a tile: index independent of j -> resident across the whole j sweep.
    a_spec = pl.BlockSpec((1, TM, D), lambda bb, i, j: (bb, i, 0))
    # b tile: streams along the innermost j axis.
    # TODO(synk): if profiling shows exposed DMA, add pipeline_mode=pl.Buffered(3) here.
    b_spec = pl.BlockSpec((1, TN, D), lambda bb, i, j: (bb, j, 0))
    out_spec = pl.BlockSpec((1, TM, TN), lambda bb, i, j: (bb, i, j))

    cost = pl.CostEstimate(
        flops=2 * B * S_pad * S_pad * D,
        transcendentals=0,                                     # rsqrt hoisted to XLA prologue
        bytes_accessed=(B * S_pad * D * in_isz                 # a: read once
                        + B * S_pad * D * in_isz * (S_pad // TM)  # b: re-read per i-block
                        + B * S_pad * S_pad * out_isz          # output write
                        + (2 * B * S_pad * 4 * (S_pad // TM) if normalize else 0)),
    )

    compiler_params = pltpu.CompilerParams(
        # No cross-iteration state left in the kernel -> fully parallel grid
        # (lets v7x shard across both TensorCores even when B * S/TM is small).
        dimension_semantics=("parallel", "parallel", "parallel"),
        vmem_limit_bytes=vmem_limit,
    )

    if normalize:
        # F.normalize semantics: x / max(||x||_2, eps) == x * rsqrt(max(sum(x^2), eps^2)).
        eps2 = jnp.float32(eps) ** 2
        a32 = a_p.astype(jnp.float32)
        b32 = b_p.astype(jnp.float32)
        inv_a = lax.rsqrt(jnp.maximum(jnp.sum(a32 * a32, axis=-1, keepdims=True), eps2))
        inv_b = lax.rsqrt(jnp.maximum(jnp.sum(b32 * b32, axis=-1), eps2))[:, None, :]

        out = pl.pallas_call(
            _similarity_norm_kernel,
            out_shape=jax.ShapeDtypeStruct((B, S_pad, S_pad), out_dtype),
            grid=grid,
            in_specs=[
                pl.BlockSpec((1, TM, 1), lambda bb, i, j: (bb, i, 0)),  # inv_a (resident)
                pl.BlockSpec((1, 1, TN), lambda bb, i, j: (bb, 0, j)),  # inv_b (streams)
                a_spec,
                b_spec,
            ],
            out_specs=out_spec,
            compiler_params=compiler_params,
            cost_estimate=cost,
        )(inv_a, inv_b, a_p, b_p)
    else:
        out = pl.pallas_call(
            _similarity_plain_kernel,
            out_shape=jax.ShapeDtypeStruct((B, S_pad, S_pad), out_dtype),
            grid=grid,
            in_specs=[a_spec, b_spec],
            out_specs=out_spec,
            compiler_params=compiler_params,
            cost_estimate=cost,
        )(a_p, b_p)

    if S_pad != S:
        out = out[:, :S, :S]
    return out


# ---------------------------------------------------------------------------
# Pure-JAX reference
# ---------------------------------------------------------------------------
def _similarity_ref(a, b, *, eps=1e-8, normalize=True):
    a = a.astype(jnp.float32)
    b = b.astype(jnp.float32)
    if normalize:
        a = a / jnp.maximum(jnp.linalg.norm(a, axis=-1, keepdims=True), eps)
        b = b / jnp.maximum(jnp.linalg.norm(b, axis=-1, keepdims=True), eps)
    return jnp.einsum("bsd,btd->bst", a, b)


if __name__ == "__main__":
    key = jax.random.PRNGKey(0)
    k1, k2, k3, k4, k5, k6 = jax.random.split(key, 6)

    # Small shapes implied by the module: batch=2, seq=8, hidden=32 (single full block).
    B, S, D = 2, 8, 32
    a = jax.random.normal(k1, (B, S, D), dtype=jnp.float32)
    b = jax.random.normal(k2, (B, S, D), dtype=jnp.float32)

    out = jax.block_until_ready(similarity(a, b, eps=1e-8, normalize=True))
    ref = _similarity_ref(a, b, eps=1e-8, normalize=True)
    assert out.shape == (B, S, S)
    assert jnp.allclose(out, ref, atol=1e-5, rtol=1e-5), "normalize=True mismatch"

    out_nn = jax.block_until_ready(similarity(a, b, eps=1e-8, normalize=False))
    ref_nn = _similarity_ref(a, b, eps=1e-8, normalize=False)
    assert jnp.allclose(out_nn, ref_nn, atol=1e-5, rtol=1e-5), "normalize=False mismatch"

    # Rectangular tiles (TM != TN): resident a/inv_a, streamed b/inv_b path.
    B2, S2, D2 = 2, 512, 64
    a2 = jax.random.normal(k3, (B2, S2, D2), dtype=jnp.float32)
    b2 = jax.random.normal(k4, (B2, S2, D2), dtype=jnp.float32)
    out2 = jax.block_until_ready(similarity(a2, b2, tiles=(256, 128)))
    ref2 = _similarity_ref(a2, b2)
    assert jnp.allclose(out2, ref2, atol=1e-4, rtol=1e-4), "rectangular-tile mismatch"

    # Ragged seq_len: padded up to a tile multiple inside the wrapper, sliced back.
    B3, S3, D3 = 1, 200, 32
    a3 = jax.random.normal(k5, (B3, S3, D3), dtype=jnp.float32)
    b3 = jax.random.normal(k6, (B3, S3, D3), dtype=jnp.float32)
    out3 = jax.block_until_ready(similarity(a3, b3, tiles=128))
    ref3 = _similarity_ref(a3, b3)
    assert out3.shape == (B3, S3, S3)
    assert jnp.allclose(out3, ref3, atol=1e-4, rtol=1e-4), "padded-seq mismatch"

    # bf16 inputs feeding the MXU natively, f32 accumulation + f32 output (out_dtype).
    a4 = a2.astype(jnp.bfloat16)
    b4 = b2.astype(jnp.bfloat16)
    out4 = jax.block_until_ready(
        similarity(a4, b4, out_dtype=jnp.float32, tiles=(256, 256)))
    ref4 = _similarity_ref(a4, b4)
    assert jnp.allclose(out4, ref4, atol=2e-3, rtol=2e-3), "bf16-input mismatch"

    print("KERNEL_OK")
</pallas_src>

<mosaic_0001>
module attributes {stable_mosaic.version = 11 : i64} {
  func.func @_similarity_norm_kernel(%arg0: i32, %arg1: i32, %arg2: i32, %arg3: memref<1x8x1xf32, #tpu.memory_space<vmem>>, %arg4: memref<1x1x8xf32, #tpu.memory_space<vmem>>, %arg5: memref<1x8x32xf32, #tpu.memory_space<vmem>>, %arg6: memref<1x8x32xf32, #tpu.memory_space<vmem>>, %arg7: memref<1x8x8xf32, #tpu.memory_space<vmem>>) attributes {dimension_semantics = [#tpu.dimension_semantics<parallel>, #tpu.dimension_semantics<parallel>, #tpu.dimension_semantics<parallel>], iteration_bounds = array<i64: 2, 1, 1>, scalar_prefetch = 0 : i64, scratch_operands = 0 : i64, tpu.core_type = #tpu.core_type<tc>, window_params = [{transform_indices = @transform_0, window_bounds = array<i64: 1, 8, 1>}, {transform_indices = @transform_1, window_bounds = array<i64: 1, 1, 8>}, {transform_indices = @transform_2, window_bounds = array<i64: 1, 8, 32>}, {transform_indices = @transform_3, window_bounds = array<i64: 1, 8, 32>}, {transform_indices = @transform_4, window_bounds = array<i64: 1, 8, 8>}]} {
    %c0 = arith.constant 0 : index
    %c0_0 = arith.constant 0 : index
    %c0_1 = arith.constant 0 : index
    %0 = vector.load %arg5[%c0, %c0_0, %c0_1] : memref<1x8x32xf32, #tpu.memory_space<vmem>>, vector<1x8x32xf32>
    %1 = vector.shape_cast %0 : vector<1x8x32xf32> to vector<8x32xf32>
    %c0_2 = arith.constant 0 : index
    %c0_3 = arith.constant 0 : index
    %c0_4 = arith.constant 0 : index
    %2 = vector.load %arg6[%c0_2, %c0_3, %c0_4] : memref<1x8x32xf32, #tpu.memory_space<vmem>>, vector<1x8x32xf32>
    %3 = vector.shape_cast %2 : vector<1x8x32xf32> to vector<8x32xf32>
    %cst = arith.constant dense<0.000000e+00> : vector<8x8xf32>
    %4 = tpu.matmul %1, %3, %cst {dimension_numbers = #tpu.dot_dimension_numbers<[1], [1], [0], [0], [0, 0, 1, 0], [], []>} : vector<8x32xf32>, vector<8x32xf32>, vector<8x8xf32> -> vector<8x8xf32>
    %c0_5 = arith.constant 0 : index
    %c0_6 = arith.constant 0 : index
    %c0_7 = arith.constant 0 : index
    %5 = vector.load %arg3[%c0_5, %c0_6, %c0_7] : memref<1x8x1xf32, #tpu.memory_space<vmem>>, vector<1x8x1xf32>
    %6 = vector.shape_cast %5 : vector<1x8x1xf32> to vector<8x1xf32>
    %7 = vector.broadcast %6 : vector<8x1xf32> to vector<8x8xf32>
    %8 = arith.mulf %4, %7 : vector<8x8xf32>
    %c0_8 = arith.constant 0 : index
    %c0_9 = arith.constant 0 : index
    %c0_10 = arith.constant 0 : index
    %9 = vector.load %arg4[%c0_8, %c0_9, %c0_10] : memref<1x1x8xf32, #tpu.memory_space<vmem>>, vector<1x1x8xf32>
    %10 = vector.shape_cast %9 : vector<1x1x8xf32> to vector<1x8xf32>
    %11 = vector.broadcast %10 : vector<1x8xf32> to vector<8x8xf32>
    %12 = arith.mulf %8, %11 : vector<8x8xf32>
    %c0_11 = arith.constant 0 : index
    %c0_12 = arith.constant 0 : index
    %c0_13 = arith.constant 0 : index
    %13 = vector.load %arg7[%c0_11, %c0_12, %c0_13] : memref<1x8x8xf32, #tpu.memory_space<vmem>>, vector<1x8x8xf32>
    %14 = vector.shape_cast %13 : vector<1x8x8xf32> to vector<8x8xf32>
    %15 = vector.shape_cast %12 : vector<8x8xf32> to vector<1x8x8xf32>
    tpu.vector_store %arg7[%c0_11, %c0_12, %c0_13], %15 {strides = array<i32>} : memref<1x8x8xf32, #tpu.memory_space<vmem>>, vector<1x8x8xf32>,
    return
  }
  func.func @transform_0(%arg0: i32, %arg1: i32, %arg2: i32) -> (i32, i32, i32) {
    %c0_i32 = arith.constant 0 : i32
    %c0_i32_0 = arith.constant 0 : i32
    return %arg0, %arg1, %c0_i32 : i32, i32, i32
  }
  func.func @transform_1(%arg0: i32, %arg1: i32, %arg2: i32) -> (i32, i32, i32) {
    %c0_i32 = arith.constant 0 : i32
    %c0_i32_0 = arith.constant 0 : i32
    return %arg0, %c0_i32, %arg2 : i32, i32, i32
  }
  func.func @transform_2(%arg0: i32, %arg1: i32, %arg2: i32) -> (i32, i32, i32) {
    %c0_i32 = arith.constant 0 : i32
    %c0_i32_0 = arith.constant 0 : i32
    return %arg0, %arg1, %c0_i32 : i32, i32, i32
  }
  func.func @transform_3(%arg0: i32, %arg1: i32, %arg2: i32) -> (i32, i32, i32) {
    %c0_i32 = arith.constant 0 : i32
    %c0_i32_0 = arith.constant 0 : i32
    return %arg0, %arg2, %c0_i32 : i32, i32, i32
  }
  func.func @transform_4(%arg0: i32, %arg1: i32, %arg2: i32) -> (i32, i32, i32) {
    %c0_i32 = arith.constant 0 : i32
    return %arg0, %arg1, %arg2 : i32, i32, i32
  }
}

</mosaic_0001>

<bundles_post_ra>
// kernel: tpu_custom_call.1
= control target key start
LH: loop header
LB: loop body
LE: loop exit
PB: predicated region body
PF: predicated region fallthrough
CT: control target
= control target key end

     0   :  { %s862_s0 = inlined_call_operand.vmem [shape: f32[2,8,1], index: 0, kind: input, shape index: {}]   ;;  %s863_s1 = inlined_call_operand.vmem [shape: f32[2,1,8], index: 1, kind: input, shape index: {}]   ;;  %s864_s2 = inlined_call_operand.vmem [shape: f32[2,8,32], index: 2, kind: input, shape index: {}]   ;;  %s865_s3 = inlined_call_operand.hbm [shape: f32[2,8,32], index: 3, kind: input, shape index: {}]   ;;  %s866_s4 = inlined_call_operand.hbm [shape: f32[2,8,8], index: 4, kind: output, shape index: {}]  }
   0x1   :  { %867 = sst [smem:[#allocation8_spill]] %s865_s3 }
   0x2   :  { %9 = vsyncpa [#allocation3], 0 }
   0x3   :  { %11 = vsyncpa [#allocation3 + $0x1], 0 }
   0x4   :  { %12 = vsyncpa [#allocation4], 0 }
   0x5   :  { %14 = vsyncpa [#allocation4 + $0x1], 0  ;;  %s731_s15 = smov 0   ;;  %s733_s16 = smov 0  }
   0x6   :  { %s735_s17 = smov 0   ;;  %s737_s18 = smov 0  }
   0x7   :  { %s739_s19 = smov 0   ;;  %s741_s20 = smov 0  }
   0x8 LB: > { %s509_s21 = sadd.s32 4294967295, %s703_s20   ;;  %s510_s22 = sadd.s32 4294967294, %s703_s20   ;;  %s703_s20 = sphi %s741_s20, %s20_s20   ;;  %s699_s19 = sphi %s739_s19, %s877_s19   ;;  %s695_s18 = sphi %s737_s18, %s876_s18   ;;  %s691_s17 = sphi %s735_s17, %s875_s17   ;;  %s687_s16 = sphi %s733_s16, %s874_s16   ;;  %s683_s15 = sphi %s731_s15, %s873_s15  }
   0x9   : > { %s39_s23 = sadd.s32 1, %s699_s19  ;;  %s132_s24 = sadd.s32 1, %s691_s17 }
   0xa   : > { %p41_p0 = scmp.ge.s32.totalorder %s39_s23, 2  ;;  %p139_p1 = scmp.ne.s32.totalorder %s691_s17, %s687_s16 }
   0xb   : > { %p140_p2 = scmp.eq.s32.totalorder %s703_s20, 0  ;;  %p145_p3 = scmp.ne.s32.totalorder %s687_s16, %s683_s15 }
   0xc   : > { %s879_s23 = smov (%p41_p0, %s39_s23), 0  ;;  %p146_p5 = scmp.eq.s32.totalorder %s509_s21, 0 }
   0xd   : > { %p772_p4 = por %p140_p2, %p139_p1  ;;  %s127_s26 = ssub.s32 %s699_s19, %s879_s23 }
   0xe   : > { %p173_p6 = scmp.eq.s32.totalorder %s509_s21, 1  ;;  %p130_p7 = scmp.eq.s32.totalorder %s127_s26, 0 }
   0xf   : > { %p778_p8 = por %p146_p5, %p145_p3  ;;  %p179_p10 = scmp.eq.s32.totalorder %s510_s22, 1 }
  0x10   : > { %p782_p9 = por %p173_p6, %p139_p1  ;;  %p512_p12 = scmp.ge.s32.totalorder %s703_s20, 2 }
  0x11   : > { %s787_s29 = scalar_select %p130_p7, %s691_s17, %s132_s24  }
  0x12   : > { %p789_p11 = por %p179_p10, %p145_p3  ;;  %p538_p13 = scmp.lt.s32.totalorder %s703_s20, 2 }
  0x13   : > { %s228_s5 = sand.u32 1, %s691_s17   ;;  %s514_s7 = sshll.u32 %s699_s19, 3 }
  0x14   : > { %s513_s6 = sshll.u32 %s228_s5, 3  ;;  %s872_s3 = sld [smem:[#allocation8_spill]] }
  0x15   : > { %s232_s11 = scalar_lea.vmem [#allocation2], %s513_s6  ;;  %p531_p0 = pnand %p538_p13, %p772_p4 }
  0x16   : > { %s241_s12 = sshll.u32 %s232_s11, 4  ;;  %p515_p1 = scmp.ge.s32.totalorder %s703_s20, 1  ;;  %s242_s12 = int_to_ptr.vmem [resolvable:$true] %s241_s12 }
  0x17   : > { %p246_p2 = scmp.lt.s32.totalorder %s703_s20, 3  ;;  %s229_s14 = scalar_lea.sflag [#allocation3], %s228_s5 }
  0x19   : > { %p247_p3 = pnand %p515_p1, %p246_p2 }
  0x1a   : > { %s237_s10 = scalar_lea.hbm %s872_s3, %s514_s7  ;;  %s805_s21 = sand.u32 (!%p247_p3), 1, %s687_s16  }
  0x1b   : > { %s239_s13 = sshll.u32 %s237_s10, 4  ;;  %250 = sbr.rel (%p247_p3) target bundleno = 174 (0xae), region = 36  ;;  %s240_s13 = int_to_ptr.hbm [resolvable:$true] %s239_s13 }
  0x1c   : > { %533 = dma.hbm_to_vmem [thread:$0]  (!%p531_p0), %s240_s13, 128, %s242_s12, %s229_s14  }
  0x1d   : > { %s516_s22 = sshll.u32 (!%p247_p3), %s805_s21, 3  ;;  %s253_s24 = scalar_lea.sflag (!%p247_p3), [#allocation3], %s805_s21 }
  0x1e   : > { %s256_s26 = scalar_lea.vmem (!%p247_p3), [#allocation2], %s516_s22 }
  0x20   : > { %674 = dma.done.wait (%p778_p8), %s253_s24, 128  }
  0x21   : > { %676 = vsyncadd (%p778_p8), %s253_s24, 4294967168  ;;  %p302_p4 = scmp.lt.s32.totalorder %s695_s18, 1  ;;  %v705_v0 = vmov 0   ;;  %vm324_vm0 = vcmask 261120   ;;  %v323_v1 = vld [vmem:[%s256_s26] sm:$0xff]  ;;  %s523_s14 = sshll.u32 %s695_s18, 3 }
  0x22   : > { %589 = vset.pattern.permute.xlu0 %v705_v0  ;;  %520 = vmatpush.xpose.msk.msra.mxu0 %vm324_vm0, %v323_v1  ;;  %s378_s6 = scalar_lea.hbm %s866_s4, %s523_s14  ;;  %s301_s26 = scalar_lea.vmem [#allocation5], %s516_s22  ;;  %vm363_vm1 = vcmask 64512  }
  0x23   : > { %s303_s25 = scalar_select %p302_p4, %s695_s18, 1 }
  0x24   : > { %s382_s7 = sshll.u32 %s378_s6, 4  ;;  %s641_s22 = scalar_lea.hbm %s866_s4, 16  ;;  %s383_s7 = int_to_ptr.hbm [resolvable:$true] %s382_s7 }
  0x25   : > { %s518_s5 = sshll.u32 %s303_s25, 3  ;;  %s314_s13 = scalar_lea.vmem %s863_s1, %s303_s25 }
  0x26   : > { %s321_s8 = scalar_lea.vmem %s864_s2, %s518_s5  ;;  %s308_s11 = scalar_lea.vmem %s862_s0, %s518_s5  ;;  %v590_v5 = vld [vmem:[%s314_s13] ss:$0 sm:$0xff] }
  0x27   : > { %v351_v2 = vld [vmem:[%s308_s11] sm:$0xff]  ;;  %s380_s5 = sshll.u32 %s301_s26, 4  ;;  %s366_s25 = scalar_lea.sflag [#allocation4], %s805_s21  ;;  %s381_s5 = int_to_ptr.vmem [resolvable:$true] %s380_s5 }
  0x28   : > { %v322_v3 = vld [vmem:[%s321_s8] sm:$0xff]  ;;  %354 = vperm.xlu0 %589, %v351_v2   ;;  %s635_s8 = sshra.s32 %s383_s7, 4  ;;  %s636_s8 = int_to_ptr.hbm [resolvable:$true] %s635_s8 }
  0x29   : > { %521 = vmatmul.msk.f32.vlgmr.msra.gmra.mxu0 %vm324_vm0, %v322_v3  ;;  %s637_s18 = scalar_lea.hbm %s636_s8, 8  ;;  %p642_p8 = scmp.lt.s32.totalorder %s636_s8, %s866_s4 }
  0x2a   : > { %p638_p5 = scmp.ne.s32.totalorder %s636_s8, %s637_s18  ;;  %p643_p10 = scmp.lt.s32.totalorder %s641_s22, %s637_s18 }
  0x2c   : > { %p639_p6 = pnand %p638_p5, %p782_p9  ;;  %p644_p13 = por %p643_p10, %p642_p8 }
  0x2e   : > { %p640_p7 = pneg %p639_p6 }
  0x30   : > { %p645_p0 = pnand %p644_p13, %p640_p7 }
  0x9a   : > { %v355_v4 = vpop.permute.xlu0 %354 }
  0xa6   : > { %v348_v6 = vpop.f32.mrf.mxu0 }
  0xa7   : > { %v357_v7 = vmul.f32 %v355_v4, %v348_v6 }
  0xa9   : > { %v362_v8 = vmul.f32 %v590_v5, %v357_v7 }
  0xab   : > { %364 = vst.msk [vmem:[%s301_s26] sm:$0xff] %vm363_vm1, %v362_v8 }
  0xac   : > { %648 = shalt.err (!%p645_p0)
}
  0xad   : > { %528 = dma.vmem_to_hbm [thread:$0]  (%p782_p9), %s381_s5, 128, %s383_s7, %s366_s25  }
  0xae PF: > { %s394_s21 = sand.u32 1, %s683_s15   ;;  %p535_p1 = pnand %p512_p12, %p789_p11 }
  0xaf   : > { %s395_s27 = scalar_lea.sflag [#allocation4], %s394_s21 }
  0xb0   : > { %p536_p2 = pneg %p535_p1 }
  0xb2   : > { %678 = dma.done.wait (%p536_p2), %s395_s27, 128  }
  0xb3   : > { %680 = vsyncadd (%p536_p2), %s395_s27, 4294967168  ;;  %s20_s20 = sadd.s32 1, %s703_s20   ;;  %s873_s15 = smov %s687_s16 }
  0xb4   : > { %p17_p3 = scmp.ge.s32.totalorder %s20_s20, 4   ;;  %s874_s16 = smov %s691_s17 }
  0xb5   : > { %s875_s17 = smov %s787_s29  ;;  %s876_s18 = smov %s699_s19 }
  0xb6   : > { %s877_s19 = smov %s879_s23  ;;  %19 = sbr.rel (!%p17_p3) target bundleno = 8 (0x8), region = 90 }
  0xbb   :  { %401 = vsyncpa [#allocation3], 1 }
  0xbc   :  { %403 = vsyncpa [#allocation3 + $0x1], 1 }
  0xbd   :  { %404 = vsyncpa [#allocation4], 1 }
  0xbe   :  { %406 = vsyncpa [#allocation4 + $0x1], 1 }

</bundles_post_ra>
